<compile_context>
chip_gen: v6e
topology: v6e:2x2x1
jax: 0.10.0
libtpu: 0.0.40
codegen_flags: <defaults>
</compile_context>

<pallas_src>
import functools

import jax
import jax.numpy as jnp
from jax import lax
from jax.experimental import pallas as pl
from jax.experimental.pallas import tpu as pltpu

LANE = 128
VMEM_LIMIT = 48 * 1024 * 1024   # conservative for v7x's 64 MiB/TC


def _round_up(n, m):
    return ((n + m - 1) // m) * m


def _pad_to(a, shape):
    pads = [(0, t - s) for s, t in zip(a.shape, shape)]
    return jnp.pad(a, pads)


# ----------------------------- Pallas kernel -------------------------------

def _fused_readout_kernel(batch_ref, x_ref, *refs, n_node_hidden, n_graph, hp):
    """Fused node MLP + gating + sum-pool + graph MLP.

    refs layout (all weights bf16, biases f32):
      [ (w, b) x n_node_hidden node hidden layers,
        (w_gate|value, b_gate|value) merged last node layer,
        (w, b) x n_graph graph layers,
        o_ref, acc_ref ]
    Grid axis 0 is a reduction over node row tiles ("arbitrary").
    """
    n_wb = 2 * (n_node_hidden + 1 + n_graph)
    w_refs = refs[:n_wb]
    o_ref = refs[n_wb]
    acc_ref = refs[n_wb + 1]

    step = pl.program_id(0)

    @pl.when(step == 0)
    def _():
        acc_ref[...] = jnp.zeros_like(acc_ref)

    # ---- node-net hidden layers on this row tile (weights VMEM-resident) ----
    h = x_ref[...].astype(jnp.bfloat16)
    idx = 0
    for _ in range(n_node_hidden):
        w = w_refs[idx][...]
        b = w_refs[idx + 1][...]
        idx += 2
        h = jnp.dot(h, w, preferred_element_type=jnp.float32) + b
        h = jnp.maximum(h, 0.0).astype(jnp.bfloat16)

    # ---- last node layer: single 2*hp-wide matmul (gate | value), split at
    #      the lane-aligned hp boundary ----
    w = w_refs[idx][...]
    b = w_refs[idx + 1][...]
    idx += 2
    gv = jnp.dot(h, w, preferred_element_type=jnp.float32) + b       # (TN, 2*hp)
    gates = jax.nn.sigmoid(gv[:, :hp])
    gated = (gv[:, hp:] * gates).astype(jnp.bfloat16)                # (TN, hp)

    # ---- sum pool via in-kernel one-hot matmul ----
    tile = x_ref.shape[0]
    gp = acc_ref.shape[0]
    graph_ids = lax.broadcasted_iota(jnp.int32, (gp, tile), 0)
    onehot = (batch_ref[...] == graph_ids).astype(jnp.bfloat16)      # (Gp, TN)
    acc_ref[...] += jnp.dot(onehot, gated, preferred_element_type=jnp.float32)

    graph_idx = idx

    # ---- finalize: graph-net MLP fused into the last reduction step ----
    @pl.when(step == pl.num_programs(0) - 1)
    def _():
        g = acc_ref[...]
        j = graph_idx
        for li in range(n_graph):
            if li > 0:
                g = jnp.maximum(g, 0.0)
            g = jnp.dot(g.astype(jnp.bfloat16), w_refs[j][...],
                        preferred_element_type=jnp.float32) + w_refs[j + 1][...]
            j += 2
        o_ref[...] = g


# ------------------------------- wrapper ------------------------------------

def readout_forward(params, x, batch, num_graphs, *, node_tile=1024):
    """Pallas Readout forward. use_gate=True, sum pooling."""
    node_layers = params["node"]
    graph_layers = params["graph"]
    hidden = params["graph_feat_dim"]

    n, d0 = x.shape
    tn = min(node_tile, _round_up(n, 8))
    n_pad = _round_up(n, tn)
    gp = _round_up(max(num_graphs, 1), 8)
    hp = _round_up(hidden, LANE)

    x32 = x.astype(jnp.float32)
    if n_pad != n:
        x32 = _pad_to(x32, (n_pad, d0))       # rows only; feature dim untouched
    # Padded rows get an out-of-range graph id so they pool into nothing.
    batch2d = jnp.full((1, n_pad), gp, jnp.int32)
    batch2d = batch2d.at[0, :n].set(batch.astype(jnp.int32))

    weight_args = []
    in_specs = [
        pl.BlockSpec((1, tn), lambda i: (0, i)),      # batch ids (int32)
        pl.BlockSpec((tn, d0), lambda i: (i, 0)),     # node features (f32)
    ]

    def add_weight(w, b, pad_din=True):
        din, dout = w.shape
        dinp = _round_up(din, LANE) if pad_din else din
        doutp = _round_up(dout, LANE)
        wp = _pad_to(w, (dinp, doutp)).astype(jnp.bfloat16)
        bp = _pad_to(b.reshape(1, -1), (1, doutp)).astype(jnp.float32)
        weight_args.extend([wp, bp])
        in_specs.append(pl.BlockSpec(wp.shape, lambda i: (0, 0)))
        in_specs.append(pl.BlockSpec(bp.shape, lambda i: (0, 0)))

    # node_net hidden layers (all but last). First layer keeps unpadded din
    # so x never needs a feature-dim pad in the wrapper.
    n_node_hidden = len(node_layers) - 1
    for li, (w, b) in enumerate(node_layers[:-1]):
        add_weight(w, b, pad_din=(li > 0))

    # Last node layer: merged (gate | value), each half padded to hp lanes.
    w_last, b_last = node_layers[-1]
    din_last = w_last.shape[0]
    dinp_last = _round_up(din_last, LANE) if n_node_hidden > 0 else din_last
    wg = _pad_to(w_last[:, :hidden], (dinp_last, hp))
    wv = _pad_to(w_last[:, hidden:], (dinp_last, hp))
    wgv = jnp.concatenate([wg, wv], axis=1).astype(jnp.bfloat16)
    bg = _pad_to(b_last[:hidden].reshape(1, -1), (1, hp))
    bv = _pad_to(b_last[hidden:].reshape(1, -1), (1, hp))
    bgv = jnp.concatenate([bg, bv], axis=1).astype(jnp.float32)
    weight_args.extend([wgv, bgv])
    in_specs.append(pl.BlockSpec(wgv.shape, lambda i: (0, 0)))
    in_specs.append(pl.BlockSpec(bgv.shape, lambda i: (0, 0)))

    # graph_net layers (used only in the finalize phase).
    for (w, b) in graph_layers:
        add_weight(w, b, pad_din=True)

    out_dim = graph_layers[-1][0].shape[1]
    outp = _round_up(out_dim, LANE)

    kernel = functools.partial(
        _fused_readout_kernel,
        n_node_hidden=n_node_hidden,
        n_graph=len(graph_layers),
        hp=hp,
    )

    out = pl.pallas_call(
        kernel,
        out_shape=jax.ShapeDtypeStruct((gp, outp), jnp.float32),
        grid=(n_pad // tn,),
        in_specs=in_specs,
        out_specs=pl.BlockSpec((gp, outp), lambda i: (0, 0)),
        scratch_shapes=[pltpu.VMEM((gp, hp), jnp.float32)],
        compiler_params=pltpu.CompilerParams(
            dimension_semantics=("arbitrary",),
            vmem_limit_bytes=VMEM_LIMIT,
        ),
    )(batch2d, x32, *weight_args)

    return out[:num_graphs, :out_dim]


# ------------------------------ parameters ---------------------------------

def init_linear(key, d_in, d_out):
    kw, kb = jax.random.split(key)
    lim = 1.0 / jnp.sqrt(jnp.float32(d_in))
    w = jax.random.uniform(kw, (d_in, d_out), jnp.float32, -lim, lim)
    b = jax.random.uniform(kb, (d_out,), jnp.float32, -lim, lim)
    return w, b


def init_readout(key, node_feat_dim, node_hiddens, graph_hiddens, use_gate=True):
    node_hiddens = list(node_hiddens)
    graph_hiddens = list(graph_hiddens)
    graph_feat_dim = node_hiddens[-1]
    if use_gate:
        node_hiddens[-1] *= 2           # matches Readout._get_node_net
    node_dims = [node_feat_dim] + node_hiddens
    graph_dims = [graph_feat_dim] + graph_hiddens
    n_node, n_graph = len(node_dims) - 1, len(graph_dims) - 1
    keys = jax.random.split(key, n_node + n_graph)
    node = [init_linear(keys[i], node_dims[i], node_dims[i + 1])
            for i in range(n_node)]
    graph = [init_linear(keys[n_node + i], graph_dims[i], graph_dims[i + 1])
             for i in range(n_graph)]
    return {"node": node, "graph": graph, "graph_feat_dim": graph_feat_dim}


# ------------------------------- reference ----------------------------------

def readout_ref(params, x, batch, num_graphs):
    hidden = params["graph_feat_dim"]
    h = x.astype(jnp.float32)
    for i, (w, b) in enumerate(params["node"]):
        if i > 0:
            h = jnp.maximum(h, 0.0)
        h = h @ w + b
    gates = jax.nn.sigmoid(h[:, :hidden])
    gated = h[:, hidden:] * gates
    pooled = jax.ops.segment_sum(gated, batch, num_segments=num_graphs)
    g = pooled
    for i, (w, b) in enumerate(params["graph"]):
        if i > 0:
            g = jnp.maximum(g, 0.0)
        g = g @ w + b
    return g


# --------------------------------- main -------------------------------------

if __name__ == "__main__":
    key = jax.random.PRNGKey(0)

    node_feat_dim = 32
    node_hiddens = [64, 32]     # graph_feat_dim = 32; last layer doubled by gate
    graph_hiddens = [64, 16]
    num_nodes = 16
    num_graphs = 2

    kp, kx = jax.random.split(key)
    params = init_readout(kp, node_feat_dim, node_hiddens, graph_hiddens,
                          use_gate=True)

    x = jax.random.normal(kx, (num_nodes, node_feat_dim), jnp.float32)
    batch = jnp.concatenate(
        [jnp.zeros(num_nodes // 2, jnp.int32),
         jnp.ones(num_nodes - num_nodes // 2, jnp.int32)]
    )

    out = readout_forward(params, x, batch, num_graphs)
    jax.block_until_ready(out)

    ref = readout_ref(params, x, batch, num_graphs)

    assert out.shape == (num_graphs, graph_hiddens[-1])
    assert bool(jnp.isfinite(out).all())
    assert bool(jnp.allclose(out, ref, rtol=2e-2, atol=2e-2)), (out, ref)
    print("KERNEL_OK")
</pallas_src>

<mosaic_0001>
module attributes {stable_mosaic.version = 11 : i64} {
  func.func @_fused_readout_kernel(%arg0: i32, %arg1: memref<1x16xi32, #tpu.memory_space<vmem>>, %arg2: memref<16x32xf32, #tpu.memory_space<vmem>>, %arg3: memref<32x128xbf16, #tpu.memory_space<vmem>>, %arg4: memref<1x128xf32, #tpu.memory_space<vmem>>, %arg5: memref<128x256xbf16, #tpu.memory_space<vmem>>, %arg6: memref<1x256xf32, #tpu.memory_space<vmem>>, %arg7: memref<128x128xbf16, #tpu.memory_space<vmem>>, %arg8: memref<1x128xf32, #tpu.memory_space<vmem>>, %arg9: memref<128x128xbf16, #tpu.memory_space<vmem>>, %arg10: memref<1x128xf32, #tpu.memory_space<vmem>>, %arg11: memref<8x128xf32, #tpu.memory_space<vmem>>, %arg12: memref<8x128xf32, #tpu.memory_space<vmem>>) attributes {dimension_semantics = [#tpu.dimension_semantics<arbitrary>], iteration_bounds = array<i64: 1>, scalar_prefetch = 0 : i64, scratch_operands = 1 : i64, tpu.core_type = #tpu.core_type<tc>, window_params = [{transform_indices = @transform_0, window_bounds = array<i64: 1, 16>}, {transform_indices = @transform_1, window_bounds = array<i64: 16, 32>}, {pipeline_mode = #tpu.pipeline_mode<synchronous>, transform_indices = @transform_2, window_bounds = array<i64: 32, 128>}, {pipeline_mode = #tpu.pipeline_mode<synchronous>, transform_indices = @transform_3, window_bounds = array<i64: 1, 128>}, {pipeline_mode = #tpu.pipeline_mode<synchronous>, transform_indices = @transform_4, window_bounds = array<i64: 128, 256>}, {pipeline_mode = #tpu.pipeline_mode<synchronous>, transform_indices = @transform_5, window_bounds = array<i64: 1, 256>}, {pipeline_mode = #tpu.pipeline_mode<synchronous>, transform_indices = @transform_6, window_bounds = array<i64: 128, 128>}, {pipeline_mode = #tpu.pipeline_mode<synchronous>, transform_indices = @transform_7, window_bounds = array<i64: 1, 128>}, {pipeline_mode = #tpu.pipeline_mode<synchronous>, transform_indices = @transform_8, window_bounds = array<i64: 128, 128>}, {pipeline_mode = #tpu.pipeline_mode<synchronous>, transform_indices = @transform_9, window_bounds = array<i64: 1, 128>}, {pipeline_mode = #tpu.pipeline_mode<synchronous>, transform_indices = @transform_10, window_bounds = array<i64: 8, 128>}]} {
    %c0_i32 = arith.constant 0 : i32
    %0 = arith.cmpi eq, %arg0, %c0_i32 : i32
    %1 = arith.extui %0 : i1 to i32
    %c0_i32_0 = arith.constant 0 : i32
    %2 = arith.cmpi ne, %1, %c0_i32_0 : i32
    scf.if %2 {
      %cst_22 = arith.constant 0.000000e+00 : f32
      %41 = vector.broadcast %cst_22 : f32 to vector<8x128xf32>
      %c0_23 = arith.constant 0 : index
      %c0_24 = arith.constant 0 : index
      %42 = vector.load %arg12[%c0_23, %c0_24] : memref<8x128xf32, #tpu.memory_space<vmem>>, vector<8x128xf32>
      tpu.vector_store %arg12[%c0_23, %c0_24], %41 {strides = array<i32>} : memref<8x128xf32, #tpu.memory_space<vmem>>, vector<8x128xf32>,
    } else {
    }
    %c0 = arith.constant 0 : index
    %c0_1 = arith.constant 0 : index
    %3 = vector.load %arg2[%c0, %c0_1] : memref<16x32xf32, #tpu.memory_space<vmem>>, vector<16x32xf32>
    %4 = arith.truncf %3 : vector<16x32xf32> to vector<16x32xbf16>
    %c0_2 = arith.constant 0 : index
    %c0_3 = arith.constant 0 : index
    %5 = vector.load %arg3[%c0_2, %c0_3] : memref<32x128xbf16, #tpu.memory_space<vmem>>, vector<32x128xbf16>
    %c0_4 = arith.constant 0 : index
    %c0_5 = arith.constant 0 : index
    %6 = vector.load %arg4[%c0_4, %c0_5] : memref<1x128xf32, #tpu.memory_space<vmem>>, vector<1x128xf32>
    %cst = arith.constant dense<0.000000e+00> : vector<16x128xf32>
    %7 = tpu.matmul %4, %5, %cst {dimension_numbers = #tpu.dot_dimension_numbers<[1], [0], [0], [1], [0, 0, 1, 1], [], []>} : vector<16x32xbf16>, vector<32x128xbf16>, vector<16x128xf32> -> vector<16x128xf32>
    %8 = vector.broadcast %6 : vector<1x128xf32> to vector<16x128xf32>
    %9 = arith.addf %7, %8 : vector<16x128xf32>
    %cst_6 = arith.constant 0.000000e+00 : f32
    %10 = vector.broadcast %cst_6 : f32 to vector<16x128xf32>
    %11 = arith.maximumf %9, %10 : vector<16x128xf32>
    %12 = arith.truncf %11 : vector<16x128xf32> to vector<16x128xbf16>
    %c0_7 = arith.constant 0 : index
    %c0_8 = arith.constant 0 : index
    %13 = vector.load %arg5[%c0_7, %c0_8] : memref<128x256xbf16, #tpu.memory_space<vmem>>, vector<128x256xbf16>
    %c0_9 = arith.constant 0 : index
    %c0_10 = arith.constant 0 : index
    %14 = vector.load %arg6[%c0_9, %c0_10] : memref<1x256xf32, #tpu.memory_space<vmem>>, vector<1x256xf32>
    %cst_11 = arith.constant dense<0.000000e+00> : vector<16x256xf32>
    %15 = tpu.matmul %12, %13, %cst_11 {dimension_numbers = #tpu.dot_dimension_numbers<[1], [0], [0], [1], [0, 0, 1, 1], [], []>} : vector<16x128xbf16>, vector<128x256xbf16>, vector<16x256xf32> -> vector<16x256xf32>
    %16 = vector.broadcast %14 : vector<1x256xf32> to vector<16x256xf32>
    %17 = arith.addf %15, %16 : vector<16x256xf32>
    %18 = vector.extract_strided_slice %17 {offsets = [0, 0], sizes = [16, 128], strides = [1, 1]} : vector<16x256xf32> to vector<16x128xf32>
    %19 = arith.negf %18 : vector<16x128xf32>
    %20 = math.exp %19 : vector<16x128xf32>
    %cst_12 = arith.constant 1.000000e+00 : f32
    %21 = vector.broadcast %cst_12 : f32 to vector<16x128xf32>
    %22 = arith.addf %21, %20 : vector<16x128xf32>
    %23 = arith.divf %21, %22 : vector<16x128xf32>
    %24 = vector.extract_strided_slice %17 {offsets = [0, 128], sizes = [16, 128], strides = [1, 1]} : vector<16x256xf32> to vector<16x128xf32>
    %25 = arith.mulf %24, %23 : vector<16x128xf32>
    %26 = arith.truncf %25 : vector<16x128xf32> to vector<16x128xbf16>
    %27 = tpu.iota {dimensions = array<i32: 0>} : vector<8x16xi32>
    %c0_13 = arith.constant 0 : index
    %c0_14 = arith.constant 0 : index
    %28 = vector.load %arg1[%c0_13, %c0_14] : memref<1x16xi32, #tpu.memory_space<vmem>>, vector<1x16xi32>
    %29 = vector.broadcast %28 : vector<1x16xi32> to vector<8x16xi32>
    %30 = arith.cmpi eq, %29, %27 : vector<8x16xi32>
    %31 = arith.extui %30 : vector<8x16xi1> to vector<8x16xi32>
    %32 = arith.sitofp %31 : vector<8x16xi32> to vector<8x16xf32>
    %33 = arith.truncf %32 : vector<8x16xf32> to vector<8x16xbf16>
    %c0_15 = arith.constant 0 : index
    %c0_16 = arith.constant 0 : index
    %34 = vector.load %arg12[%c0_15, %c0_16] : memref<8x128xf32, #tpu.memory_space<vmem>>, vector<8x128xf32>
    %cst_17 = arith.constant dense<0.000000e+00> : vector<8x128xf32>
    %35 = tpu.matmul %33, %26, %cst_17 {dimension_numbers = #tpu.dot_dimension_numbers<[1], [0], [0], [1], [0, 0, 1, 1], [], []>} : vector<8x16xbf16>, vector<16x128xbf16>, vector<8x128xf32> -> vector<8x128xf32>
    %36 = arith.addf %34, %35 : vector<8x128xf32>
    %c0_18 = arith.constant 0 : index
    %c0_19 = arith.constant 0 : index
    %37 = vector.load %arg12[%c0_18, %c0_19] : memref<8x128xf32, #tpu.memory_space<vmem>>, vector<8x128xf32>
    tpu.vector_store %arg12[%c0_18, %c0_19], %36 {strides = array<i32>} : memref<8x128xf32, #tpu.memory_space<vmem>>, vector<8x128xf32>,
    %c0_i32_20 = arith.constant 0 : i32
    %38 = arith.cmpi eq, %arg0, %c0_i32_20 : i32
    %39 = arith.extui %38 : i1 to i32
    %c0_i32_21 = arith.constant 0 : i32
    %40 = arith.cmpi ne, %39, %c0_i32_21 : i32
    scf.if %40 {
      %c0_22 = arith.constant 0 : index
      %c0_23 = arith.constant 0 : index
      %41 = vector.load %arg12[%c0_22, %c0_23] : memref<8x128xf32, #tpu.memory_space<vmem>>, vector<8x128xf32>
      %42 = arith.truncf %41 : vector<8x128xf32> to vector<8x128xbf16>
      %c0_24 = arith.constant 0 : index
      %c0_25 = arith.constant 0 : index
      %43 = vector.load %arg7[%c0_24, %c0_25] : memref<128x128xbf16, #tpu.memory_space<vmem>>, vector<128x128xbf16>
      %cst_26 = arith.constant dense<0.000000e+00> : vector<8x128xf32>
      %44 = tpu.matmul %42, %43, %cst_26 {dimension_numbers = #tpu.dot_dimension_numbers<[1], [0], [0], [1], [0, 0, 1, 1], [], []>} : vector<8x128xbf16>, vector<128x128xbf16>, vector<8x128xf32> -> vector<8x128xf32>
      %c0_27 = arith.constant 0 : index
      %c0_28 = arith.constant 0 : index
      %45 = vector.load %arg8[%c0_27, %c0_28] : memref<1x128xf32, #tpu.memory_space<vmem>>, vector<1x128xf32>
      %46 = vector.broadcast %45 : vector<1x128xf32> to vector<8x128xf32>
      %47 = arith.addf %44, %46 : vector<8x128xf32>
      %cst_29 = arith.constant 0.000000e+00 : f32
      %48 = vector.broadcast %cst_29 : f32 to vector<8x128xf32>
      %49 = arith.maximumf %47, %48 : vector<8x128xf32>
      %50 = arith.truncf %49 : vector<8x128xf32> to vector<8x128xbf16>
      %c0_30 = arith.constant 0 : index
      %c0_31 = arith.constant 0 : index
      %51 = vector.load %arg9[%c0_30, %c0_31] : memref<128x128xbf16, #tpu.memory_space<vmem>>, vector<128x128xbf16>
      %cst_32 = arith.constant dense<0.000000e+00> : vector<8x128xf32>
      %52 = tpu.matmul %50, %51, %cst_32 {dimension_numbers = #tpu.dot_dimension_numbers<[1], [0], [0], [1], [0, 0, 1, 1], [], []>} : vector<8x128xbf16>, vector<128x128xbf16>, vector<8x128xf32> -> vector<8x128xf32>
      %c0_33 = arith.constant 0 : index
      %c0_34 = arith.constant 0 : index
      %53 = vector.load %arg10[%c0_33, %c0_34] : memref<1x128xf32, #tpu.memory_space<vmem>>, vector<1x128xf32>
      %54 = vector.broadcast %53 : vector<1x128xf32> to vector<8x128xf32>
      %55 = arith.addf %52, %54 : vector<8x128xf32>
      %c0_35 = arith.constant 0 : index
      %c0_36 = arith.constant 0 : index
      %56 = vector.load %arg11[%c0_35, %c0_36] : memref<8x128xf32, #tpu.memory_space<vmem>>, vector<8x128xf32>
      tpu.vector_store %arg11[%c0_35, %c0_36], %55 {strides = array<i32>} : memref<8x128xf32, #tpu.memory_space<vmem>>, vector<8x128xf32>,
    } else {
    }
    return
  }
  func.func @transform_0(%arg0: i32) -> (i32, i32) {
    %c0_i32 = arith.constant 0 : i32
    %c0_i32_0 = arith.constant 0 : i32
    return %c0_i32, %arg0 : i32, i32
  }
  func.func @transform_1(%arg0: i32) -> (i32, i32) {
    %c0_i32 = arith.constant 0 : i32
    %c0_i32_0 = arith.constant 0 : i32
    return %arg0, %c0_i32 : i32, i32
  }
  func.func @transform_2(%arg0: i32) -> (i32, i32) {
    %c0_i32 = arith.constant 0 : i32
    %c0_i32_0 = arith.constant 0 : i32
    %c0_i32_1 = arith.constant 0 : i32
    return %c0_i32, %c0_i32_0 : i32, i32
  }
  func.func @transform_3(%arg0: i32) -> (i32, i32) {
    %c0_i32 = arith.constant 0 : i32
    %c0_i32_0 = arith.constant 0 : i32
    %c0_i32_1 = arith.constant 0 : i32
    return %c0_i32, %c0_i32_0 : i32, i32
  }
  func.func @transform_4(%arg0: i32) -> (i32, i32) {
    %c0_i32 = arith.constant 0 : i32
    %c0_i32_0 = arith.constant 0 : i32
    %c0_i32_1 = arith.constant 0 : i32
    return %c0_i32, %c0_i32_0 : i32, i32
  }
  func.func @transform_5(%arg0: i32) -> (i32, i32) {
    %c0_i32 = arith.constant 0 : i32
    %c0_i32_0 = arith.constant 0 : i32
    %c0_i32_1 = arith.constant 0 : i32
    return %c0_i32, %c0_i32_0 : i32, i32
  }
  func.func @transform_6(%arg0: i32) -> (i32, i32) {
    %c0_i32 = arith.constant 0 : i32
    %c0_i32_0 = arith.constant 0 : i32
    %c0_i32_1 = arith.constant 0 : i32
    return %c0_i32, %c0_i32_0 : i32, i32
  }
  func.func @transform_7(%arg0: i32) -> (i32, i32) {
    %c0_i32 = arith.constant 0 : i32
    %c0_i32_0 = arith.constant 0 : i32
    %c0_i32_1 = arith.constant 0 : i32
    return %c0_i32, %c0_i32_0 : i32, i32
  }
  func.func @transform_8(%arg0: i32) -> (i32, i32) {
    %c0_i32 = arith.constant 0 : i32
    %c0_i32_0 = arith.constant 0 : i32
    %c0_i32_1 = arith.constant 0 : i32
    return %c0_i32, %c0_i32_0 : i32, i32
  }
  func.func @transform_9(%arg0: i32) -> (i32, i32) {
    %c0_i32 = arith.constant 0 : i32
    %c0_i32_0 = arith.constant 0 : i32
    %c0_i32_1 = arith.constant 0 : i32
    return %c0_i32, %c0_i32_0 : i32, i32
  }
  func.func @transform_10(%arg0: i32) -> (i32, i32) {
    %c0_i32 = arith.constant 0 : i32
    %c0_i32_0 = arith.constant 0 : i32
    %c0_i32_1 = arith.constant 0 : i32
    return %c0_i32, %c0_i32_0 : i32, i32
  }
}

</mosaic_0001>

<bundles_post_ra>
// kernel: tpu_custom_call.1
= control target key start
LH: loop header
LB: loop body
LE: loop exit
PB: predicated region body
PF: predicated region fallthrough
CT: control target
= control target key end

     0   :  { %15 = vsyncpa [#allocation4], 0  ;;  %s1132_s0 = inlined_call_operand.hbm [shape: s32[1,16], index: 0, kind: input, shape index: {}]   ;;  %s1133_s1 = inlined_call_operand.hbm [shape: f32[16,32], index: 1, kind: input, shape index: {}]   ;;  %s1134_s2 = inlined_call_operand.hbm [shape: bf16[32,128], index: 2, kind: input, shape index: {}]   ;;  %s1135_s3 = inlined_call_operand.vmem [shape: f32[1,128], index: 3, kind: input, shape index: {}]   ;;  %s1136_s4 = inlined_call_operand.hbm [shape: bf16[128,256], index: 4, kind: input, shape index: {}]   ;;  %s1137_s5 = inlined_call_operand.vmem [shape: f32[1,256], index: 5, kind: input, shape index: {}]   ;;  %s1138_s6 = inlined_call_operand.hbm [shape: bf16[128,128], index: 6, kind: input, shape index: {}]   ;;  %s1139_s7 = inlined_call_operand.vmem [shape: f32[1,128], index: 7, kind: input, shape index: {}]   ;;  %s1140_s8 = inlined_call_operand.hbm [shape: bf16[128,128], index: 8, kind: input, shape index: {}]   ;;  %s1141_s9 = inlined_call_operand.vmem [shape: f32[1,128], index: 9, kind: input, shape index: {}]   ;;  %s1142_s10 = inlined_call_operand.hbm [shape: f32[8,128], index: 10, kind: output, shape index: {}]  }
   0x1   :  { %16 = vsyncpa [#allocation7], 0 }
   0x2   :  { %17 = vsyncpa [#allocation10], 0 }
   0x3   :  { %18 = vsyncpa [#allocation13], 0 }
   0x4   :  { %19 = vsyncpa [#allocation5], 0  ;;  %s1002_s13 = smov [#allocation6]  }
   0x5   :  { %s35_s14 = sshll.u32 %s1002_s13, 4  ;;  %s36_s14 = int_to_ptr.vmem [resolvable:$true] %s35_s14 }
   0x6   :  { %s860_s15 = scalar_lea.vmem %s36_s14, 256  ;;  %p865_p1 = scmp.lt.s32.totalorder %s36_s14, %s36_s14 }
   0x7   :  { %p861_p0 = scmp.ne.s32.totalorder %s36_s14, %s860_s15  ;;  %p866_p2 = scmp.lt.s32.totalorder %s860_s15, %s860_s15 }
   0x9   :  { %p867_p3 = por %p866_p2, %p865_p1 }
   0xb   :  { %p868_p4 = pnand %p867_p3, %p861_p0 }
   0xd   :  { %871 = shalt.err (!%p868_p4)
}
   0xe   :  { %s1003_s16 = smov 128   ;;  %s1004_s17 = smov 8  }
   0xf   :  { %41 = dma.hbm_to_vmem [thread:$0]  %s1133_s1, 256, %s36_s14, [#allocation7], %s1003_s16, %s1003_s16, %s1004_s17  }
  0x10   :  { %s1005_s20 = smov [#allocation9]   ;;  %s1006_s22 = smov [#allocation3]  }
  0x11   :  { %s61_s21 = sshll.u32 %s1005_s20, 4  ;;  %s26_s23 = sshll.u32 %s1006_s22, 4  ;;  %s62_s21 = int_to_ptr.vmem [resolvable:$true] %s61_s21  ;;  %s27_s23 = int_to_ptr.vmem [resolvable:$true] %s26_s23 }
  0x12   :  { %s880_s24 = scalar_lea.vmem %s62_s21, 2048  ;;  %p885_p6 = scmp.lt.s32.totalorder %s62_s21, %s62_s21 }
  0x13   :  { %p881_p5 = scmp.ne.s32.totalorder %s62_s21, %s880_s24  ;;  %p886_p7 = scmp.lt.s32.totalorder %s880_s24, %s880_s24 }
  0x15   :  { %p887_p8 = por %p886_p7, %p885_p6 }
  0x17   :  { %p888_p9 = pnand %p887_p8, %p881_p5 }
  0x19   :  { %891 = shalt.err (!%p888_p9)
}
  0x1a   :  { %67 = dma.hbm_to_vmem [thread:$0]  %s1136_s4, 2048, %s62_s21, [#allocation10], %s1003_s16, %s1003_s16, %s1004_s17  }
  0x1b   :  { %s900_s27 = scalar_lea.vmem %s27_s23, 16  ;;  %s904_s1 = scalar_lea.vmem %s27_s23, 32 }
  0x1c   :  { %p901_p10 = scmp.ne.s32.totalorder %s27_s23, %s900_s27  ;;  %p905_p11 = scmp.lt.s32.totalorder %s27_s23, %s27_s23 }
  0x1d   :  { %p906_p12 = scmp.lt.s32.totalorder %s904_s1, %s900_s27 }
  0x1f   :  { %p907_p13 = por %p906_p12, %p905_p11 }
  0x21   :  { %p908_p0 = pnand %p907_p13, %p901_p10 }
  0x23   :  { %911 = shalt.err (!%p908_p0)
}
  0x24   :  { %29 = dma.hbm_to_vmem [thread:$0]  %s1132_s0, 16, %s27_s23, [#allocation4]  }
  0x25   :  { %s1007_s30 = smov [#allocation8]  }
  0x26   :  { %s47_s11 = sshll.u32 %s1007_s30, 4  ;;  %s48_s11 = int_to_ptr.vmem [resolvable:$true] %s47_s11 }
  0x27   :  { %s920_s12 = scalar_lea.vmem %s48_s11, 256  ;;  %p925_p2 = scmp.lt.s32.totalorder %s48_s11, %s48_s11 }
  0x28   :  { %p921_p1 = scmp.ne.s32.totalorder %s48_s11, %s920_s12  ;;  %p926_p3 = scmp.lt.s32.totalorder %s920_s12, %s920_s12 }
  0x2a   :  { %p927_p4 = por %p926_p3, %p925_p2 }
  0x2c   :  { %p928_p5 = pnand %p927_p4, %p921_p1 }
  0x2e   :  { %931 = shalt.err (!%p928_p5)
}
  0x2f   :  { %s1008_s4 = smov 64   ;;  %s1009_s13 = smov 4  }
  0x30   :  { %53 = dma.hbm_to_vmem [thread:$0]  %s1134_s2, 256, %s48_s11, [#allocation7], %s1008_s4, %s1008_s4, %s1009_s13  }
  0x31   :  { %s1010_s16 = smov [#allocation11]   ;;  %s1011_s18 = smov [#allocation12]  }
  0x32   :  { %s75_s17 = sshll.u32 %s1010_s16, 4  ;;  %s89_s0 = sshll.u32 %s1011_s18, 4  ;;  %s76_s17 = int_to_ptr.vmem [resolvable:$true] %s75_s17  ;;  %s90_s0 = int_to_ptr.vmem [resolvable:$true] %s89_s0 }
  0x33   :  { %s940_s19 = scalar_lea.vmem %s76_s17, 1024  ;;  %p945_p7 = scmp.lt.s32.totalorder %s76_s17, %s76_s17 }
  0x34   :  { %p941_p6 = scmp.ne.s32.totalorder %s76_s17, %s940_s19  ;;  %p946_p8 = scmp.lt.s32.totalorder %s940_s19, %s940_s19 }
  0x36   :  { %p947_p9 = por %p946_p8, %p945_p7 }
  0x38   :  { %p948_p10 = pnand %p947_p9, %p941_p6 }
  0x3a   :  { %951 = shalt.err (!%p948_p10)
}
  0x3b   :  { %81 = dma.hbm_to_vmem [thread:$0]  %s1138_s6, 1024, %s76_s17, [#allocation10], %s1008_s4, %s1008_s4, %s1009_s13  }
  0x3c   :  { %s960_s22 = scalar_lea.vmem %s90_s0, 1024  ;;  %p965_p12 = scmp.lt.s32.totalorder %s90_s0, %s90_s0 }
  0x3d   :  { %p961_p11 = scmp.ne.s32.totalorder %s90_s0, %s960_s22  ;;  %p966_p13 = scmp.lt.s32.totalorder %s960_s22, %s960_s22 }
  0x3f   :  { %p967_p0 = por %p966_p13, %p965_p12 }
  0x41   :  { %p968_p1 = pnand %p967_p0, %p961_p11 }
  0x43   :  { %971 = shalt.err (!%p968_p1)
}
  0x44   :  { %95 = dma.hbm_to_vmem [thread:$0]  %s1140_s8, 1024, %s90_s0, [#allocation13], %s1008_s4, %s1008_s4, %s1009_s13  }
  0x45   :  { %992 = dma.done.wait [#allocation4], 16  }
  0x46   :  { %993 = vsyncadd [#allocation4], 4294967280 }
  0x47   :  { %994 = dma.done.wait [#allocation7], 512  }
  0x48   :  { %995 = vsyncadd [#allocation7], 4294966784 }
  0x49   :  { %996 = dma.done.wait [#allocation10], 3072  }
  0x4a   :  { %997 = vsyncadd [#allocation10], 4294964224 }
  0x4b   :  { %998 = dma.done.wait [#allocation13], 1024  }
  0x4c   :  { %999 = vsyncadd [#allocation13], 4294966272  ;;  %v1012_v0 = vmov 0.0   ;;  %vm1013_vm0 = vmmov 0   ;;  %v802_v1 = vld [vmem:[#allocation8 + $0x8] sm:$0xff]   ;;  %v803_v2 = vld [vmem:[#allocation8] sm:$0xff]   ;;  %v214_v33 = vlaneseq }
  0x4d   :  { %734 = vmatprep.subr.bf16.mxu0 %v1012_v0  ;;  %738 = vmatprep.mubr.msk.bf16.mxu0 %vm1013_vm0, %v1012_v0  ;;  %v122_v3 = vld [vmem:[#allocation6] sm:$0xff]  ;;  %v123_v4 = vld [vmem:[#allocation6 + $0x8] sm:$0xff]  ;;  %v804_v5 = vld [vmem:[#allocation9 + $0x74] ss:$8 sps:$4 sm:$0xff]   ;;  %vm148_vm1 = vcmask 261120   ;;  %v1014_v22 = vmov 0  }
  0x4e   :  { %735 = vmatpush3.bf16.msra.mxu0 %v802_v1  ;;  %v806_v6 = vld [vmem:[#allocation9 + $0x70] ss:$8 sps:$4 sm:$0xff]   ;;  %v807_v7 = vld [vmem:[#allocation9 + $0x64] ss:$8 sps:$4 sm:$0xff]   ;;  %v124_v8 = vpack.c.bf16 %v123_v4, %v122_v3  ;;  %304 = vmatprep.subr.bf16.mxu1 %v804_v5  ;;  %v809_v9 = vld [vmem:[#allocation9 + $0x60] ss:$8 sps:$4 sm:$0xff]  }
  0x4f   :  { %736 = vmatprep.subr.bf16.mxu0 %v1012_v0  ;;  %305 = vmatpush1.bf16.msra.mxu1 %v806_v6  ;;  %v810_v10 = vld [vmem:[#allocation9 + $0x54] ss:$8 sps:$4 sm:$0xff]   ;;  %v812_v11 = vld [vmem:[#allocation9 + $0x50] ss:$8 sps:$4 sm:$0xff]   ;;  %v813_v12 = vld [vmem:[#allocation9 + $0x44] ss:$8 sps:$4 sm:$0xff]  }
  0x50   :  { %306 = vmatprep.subr.bf16.mxu1 %v807_v7  ;;  %v815_v13 = vld [vmem:[#allocation9 + $0x40] ss:$8 sps:$4 sm:$0xff]   ;;  %v816_v14 = vld [vmem:[#allocation9 + $0x34] ss:$8 sps:$4 sm:$0xff]   ;;  %v818_v15 = vld [vmem:[#allocation9 + $0x30] ss:$8 sps:$4 sm:$0xff]   ;;  %336 = vmatprep.mubr.bf16.mxu1 %v1014_v22 }
  0x51   :  { %v819_v16 = vld [vmem:[#allocation9 + $0x24] ss:$8 sps:$4 sm:$0xff]   ;;  %v821_v17 = vld [vmem:[#allocation9 + $0x20] ss:$8 sps:$4 sm:$0xff]   ;;  %v822_v18 = vld [vmem:[#allocation9 + $0x14] ss:$8 sps:$4 sm:$0xff]  }
  0x52   :  { %737 = vmatpush3.bf16.msra.mxu0 %v803_v2  ;;  %v824_v19 = vld [vmem:[#allocation9 + $0x10] ss:$8 sps:$4 sm:$0xff]   ;;  %v825_v20 = vld [vmem:[#allocation9 + $0x4] ss:$8 sps:$4 sm:$0xff]   ;;  %v827_v21 = vld [vmem:[#allocation9] ss:$8 sps:$4 sm:$0xff]  }
  0x53   :  { %742 = vmatprep.subr.bf16.mxu0 %v1012_v0  ;;  %307 = vmatpush1.bf16.msra.mxu1 %v809_v9  ;;  %v668_v23 = vld [vmem:[%s1135_s3] ss:$0 sm:$0xff]  ;;  %v215_v34 = vshrl.u32 %v214_v33, 7  ;;  %vm374_vm3 = vcmask 130048   ;;  %v829_v63 = vld [vmem:[#allocation11 + $0x30] sm:$0xff]   ;;  %v830_v1 = vld [vmem:[#allocation11 + $0x28] sm:$0xff]  }
  0x54   :  { %308 = vmatprep.subr.bf16.mxu1 %v810_v10  ;;  %v212_v36 = vld [vmem:[%s1137_s5] sm:$0x3]  ;;  %v831_v2 = vld [vmem:[#allocation11 + $0x20] sm:$0xff]   ;;  %v833_v4 = vld [vmem:[#allocation11 + $0x10] sm:$0xff]   ;;  %s1015_s1 = smov [#allocation14]  }
  0x55   :  { %739 = vmatmul.mubr.msk.bf16.vlgmr.msra.gmra.mxu0 %vm148_vm1, %v124_v8  ;;  %v216_v35 = vsub.s32 0, %v215_v34  ;;  %v220_v49 = vsub.s32 1, %v215_v34  ;;  %v690_v51 = vld [vmem:[#allocation3] ss:$0 sm:$0xff]  ;;  %v834_v5 = vld [vmem:[#allocation11 + $0x8] sm:$0xff]   ;;  %v835_v6 = vld [vmem:[#allocation11] sm:$0xff]  }
  0x56   :  { %744 = vmatprep.mubr.msk.bf16.mxu0 %vm1013_vm0, %v1012_v0  ;;  %vm369_vm2 = vcmp.eq.s32.totalorder %v690_v51, %v215_v34  ;;  %v828_v62 = vld [vmem:[#allocation11 + $0x38] sm:$0xff]   ;;  %v837_v8 = vld [vmem:[#allocation12 + $0x30] sm:$0xff]   ;;  %v838_v9 = vld [vmem:[#allocation12 + $0x28] sm:$0xff]   ;;  %s656_s28 = sshll.u32 %s1015_s1, 4  ;;  %s657_s28 = int_to_ptr.vmem [resolvable:$true] %s656_s28 }
  0x57   :  { %309 = vmatpush1.bf16.msra.mxu1 %v812_v11  ;;  %v217_v37 = vrot.slane %v212_v36, %v216_v35  ;;  %v221_v50 = vrot.slane %v212_v36, %v220_v49  ;;  %v691_v59 = vsel %vm369_vm2, 1.0, %v1012_v0  ;;  %v832_v3 = vld [vmem:[#allocation11 + $0x18] sm:$0xff]   ;;  %v839_v10 = vld [vmem:[#allocation12 + $0x20] sm:$0xff]   ;;  %p977_p3 = scmp.lt.s32.totalorder %s657_s28, %s657_s28 }
  0x58   :  { %310 = vmatprep.subr.bf16.mxu1 %v813_v12  ;;  %v372_v61 = vpack.c.bf16 %v691_v59, %v691_v59  ;;  %v836_v7 = vld [vmem:[#allocation12 + $0x38] sm:$0xff]   ;;  %v841_v12 = vld [vmem:[#allocation12 + $0x10] sm:$0xff]  }
  0x59   :  { %v840_v11 = vld [vmem:[#allocation12 + $0x18] sm:$0xff]  }
  0x5b   :  { %311 = vmatpush1.bf16.msra.mxu1 %v815_v13 }
  0x5c   :  { %312 = vmatprep.subr.bf16.mxu1 %v816_v14 }
  0x5f   :  { %313 = vmatpush1.bf16.msra.mxu1 %v818_v15 }
  0x60   :  { %314 = vmatprep.subr.bf16.mxu1 %v819_v16 }
  0x63   :  { %315 = vmatpush1.bf16.msra.mxu1 %v821_v17 }
  0x64   :  { %316 = vmatprep.subr.bf16.mxu1 %v822_v18  ;;  %v842_v18 = vld [vmem:[#allocation12 + $0x8] sm:$0xff]  }
  0x67   :  { %317 = vmatpush1.bf16.msra.mxu1 %v824_v19  ;;  %v843_v19 = vld [vmem:[#allocation12] sm:$0xff]  }
  0x68   :  { %318 = vmatprep.subr.bf16.mxu1 %v825_v20  ;;  %v693_v20 = vld [vmem:[%s1139_s7] ss:$0 sm:$0xff]  ;;  %s972_s7 = scalar_lea.vmem %s657_s28, 128 }
  0x69   :  { %p973_p2 = scmp.ne.s32.totalorder %s657_s28, %s972_s7  ;;  %p978_p4 = scmp.lt.s32.totalorder %s972_s7, %s972_s7 }
  0x6b   :  { %319 = vmatpush1.bf16.msra.mxu1 %v827_v21  ;;  %p979_p5 = por %p978_p4, %p977_p3 }
  0x6c   :  { %768 = vmatprep.subr.bf16.mxu1 %v1012_v0 }
  0x6d   :  { %p980_p6 = pnand %p979_p5, %p973_p2 }
 0x115   :  { %v186_v24 = vpop.f32.mrf.mxu0 }
 0x116   :  { %v187_v26 = vadd.f32 %v668_v23, %v186_v24 }
 0x117   :  { %v740_v25 = vpop.f32.mrf.mxu0 }
 0x118   :  { %v193_v30 = vmax.f32 %v187_v26, 0.0 }
 0x119   :  { %v189_v27 = vpop.f32.mrf.mxu0 }
 0x11a   :  { %v190_v28 = vadd.f32 %v668_v23, %v189_v27 }
 0x11b   :  { %v741_v29 = vpop.f32.mrf.mxu0 }
 0x11c   :  { %v194_v31 = vmax.f32 %v190_v28, 0.0  ;;  %v702_v28 = vld [vmem:[%s1141_s9] ss:$0 sm:$0xff] }
 0x11e   :  { %v195_v32 = vpack.c.bf16 %v194_v31, %v193_v30 }
 0x120   :  { %337 = vmatmul.mubr.bf16.vlgmr.msra.gmra.mxu1 %v195_v32 }
 0x121   :  { %784 = vmatprep.mubr.msk.bf16.mxu1 %vm1013_vm0, %v1012_v0  ;;  %769 = vmatpush3.bf16.msra.mxu1 %v836_v7 }
 0x122   :  { %770 = vmatprep.subr.bf16.mxu1 %v1012_v0 }
 0x125   :  { %771 = vmatpush3.bf16.msra.mxu1 %v837_v8 }
 0x126   :  { %772 = vmatprep.subr.bf16.mxu1 %v1012_v0 }
 0x129   :  { %773 = vmatpush3.bf16.msra.mxu1 %v838_v9 }
 0x12a   :  { %774 = vmatprep.subr.bf16.mxu1 %v1012_v0 }
 0x12d   :  { %775 = vmatpush3.bf16.msra.mxu1 %v839_v10 }
 0x12e   :  { %776 = vmatprep.subr.bf16.mxu1 %v1012_v0 }
 0x131   :  { %777 = vmatpush3.bf16.msra.mxu1 %v840_v11 }
 0x132   :  { %778 = vmatprep.subr.bf16.mxu1 %v1012_v0 }
 0x135   :  { %779 = vmatpush3.bf16.msra.mxu1 %v841_v12 }
 0x136   :  { %780 = vmatprep.subr.bf16.mxu1 %v1012_v0 }
 0x139   :  { %781 = vmatpush3.bf16.msra.mxu1 %v842_v18 }
 0x13a   :  { %782 = vmatprep.subr.bf16.mxu1 %v1012_v0 }
 0x13d   :  { %783 = vmatpush3.bf16.msra.mxu1 %v843_v19 }
 0x1e0   :  { %v338_v38 = vpop.f32.mrf.mxu1 }
 0x1e1   :  { %v339_v39 = vadd.f32 %v338_v38, %v217_v37 }
 0x1e2   :  { %v340_v40 = vpop.f32.mrf.mxu1 }
 0x1e3   :  { %v688_v41 = vmul.f32 -1.442695, %v339_v39  ;;  %v341_v54 = vadd.f32 %v340_v40, %v221_v50 }
 0x1e4   :  { %v342_v42 = vpop.f32.mrf.mxu1 }
 0x1e5   :  { %844 = vpow2.f32 %v688_v41  ;;  %v343_v43 = vadd.f32 %v342_v42, %v217_v37 }
 0x1e6   :  { %v344_v52 = vpop.f32.mrf.mxu1 }
 0x1e7   :  { %v689_v44 = vmul.f32 -1.442695, %v343_v43  ;;  %v345_v55 = vadd.f32 %v344_v52, %v221_v50 }
 0x1e9   :  { %846 = vpow2.f32 %v689_v44 }
 0x1f2   :  { %v845_v45 = vpop.eup %844 }
 0x1f3   :  { %v353_v46 = vadd.f32 1.0, %v845_v45 }
 0x1f5   :  { %848 = vrcp.f32 %v353_v46 }
 0x1f6   :  { %v847_v47 = vpop.eup %846 }
 0x1f7   :  { %v354_v48 = vadd.f32 1.0, %v847_v47 }
 0x1f9   :  { %850 = vrcp.f32 %v354_v48 }
 0x202   :  { %v849_v53 = vpop.eup %848 }
 0x203   :  { %v359_v57 = vmul.f32 %v849_v53, %v341_v54 }
 0x206   :  { %v851_v56 = vpop.eup %850 }
 0x207   :  { %v360_v58 = vmul.f32 %v851_v56, %v345_v55 }
 0x209   :  { %v361_v60 = vpack.c.bf16 %v360_v58, %v359_v57 }
 0x20b   :  { %743 = vmatpush3.bf16.msra.mxu0 %v361_v60 }
 0x20c   :  { %748 = vmatprep.subr.bf16.mxu0 %v1012_v0 }
 0x20e   :  { %745 = vmatmul.mubr.msk.bf16.vlgmr.msra.gmra.mxu0 %vm374_vm3, %v372_v61 }
 0x20f   :  { %749 = vmatpush3.bf16.msra.mxu0 %v828_v62  ;;  %764 = vmatprep.mubr.msk.bf16.mxu0 %vm1013_vm0, %v1012_v0 }
 0x210   :  { %750 = vmatprep.subr.bf16.mxu0 %v1012_v0 }
 0x213   :  { %751 = vmatpush3.bf16.msra.mxu0 %v829_v63 }
 0x214   :  { %752 = vmatprep.subr.bf16.mxu0 %v1012_v0 }
 0x217   :  { %753 = vmatpush3.bf16.msra.mxu0 %v830_v1 }
 0x218   :  { %754 = vmatprep.subr.bf16.mxu0 %v1012_v0 }
 0x21b   :  { %755 = vmatpush3.bf16.msra.mxu0 %v831_v2 }
 0x21c   :  { %756 = vmatprep.subr.bf16.mxu0 %v1012_v0 }
 0x21f   :  { %757 = vmatpush3.bf16.msra.mxu0 %v832_v3 }
 0x220   :  { %758 = vmatprep.subr.bf16.mxu0 %v1012_v0 }
 0x223   :  { %759 = vmatpush3.bf16.msra.mxu0 %v833_v4 }
 0x224   :  { %760 = vmatprep.subr.bf16.mxu0 %v1012_v0 }
 0x227   :  { %761 = vmatpush3.bf16.msra.mxu0 %v834_v5 }
 0x228   :  { %762 = vmatprep.subr.bf16.mxu0 %v1012_v0 }
 0x22b   :  { %763 = vmatpush3.bf16.msra.mxu0 %v835_v6 }
 0x2ce   :  { %v412_v13 = vpop.f32.mrf.mxu0 }
 0x2cf   :  { %v424_v14 = vpack.c.bf16 %v412_v13, %v412_v13 }
 0x2d0   :  { %v746_v15 = vpop.f32.mrf.mxu0 }
 0x2d1   :  { %765 = vmatmul.mubr.bf16.vlgmr.msra.gmra.mxu0 %v424_v14 }
 0x2d2   :  { %v415_v16 = vpop.f32.mrf.mxu0 }
 0x2d4   :  { %v747_v17 = vpop.f32.mrf.mxu0 }
 0x391   :  { %v530_v21 = vpop.f32.mrf.mxu0 }
 0x392   :  { %v531_v22 = vadd.f32 %v693_v20, %v530_v21 }
 0x393   :  { %v766_v23 = vpop.f32.mrf.mxu0 }
 0x394   :  { %v536_v24 = vmax.f32 %v531_v22, 0.0 }
 0x395   :  { %v533_v25 = vpop.f32.mrf.mxu0 }
 0x396   :  { %v537_v26 = vpack.c.bf16 %v536_v24, %v536_v24 }
 0x397   :  { %v767_v27 = vpop.f32.mrf.mxu0 }
 0x398   :  { %785 = vmatmul.mubr.bf16.vlgmr.msra.gmra.mxu1 %v537_v26 }
 0x458   :  { %v643_v0 = vpop.f32.mrf.mxu1 }
 0x459   :  { %v644_v29 = vadd.f32 %v702_v28, %v643_v0 }
 0x45a   :  { %v786_v30 = vpop.f32.mrf.mxu1 }
 0x45b   :  { %649 = vst [vmem:[#allocation14] sm:$0xff] %v644_v29 }
 0x45c   :  { %v646_v31 = vpop.f32.mrf.mxu1 }
 0x45d   :  { %983 = shalt.err (!%p980_p6)
}
 0x45e   :  { %659 = dma.vmem_to_hbm [thread:$0]  %s657_s28, 128, %s1142_s10, [#allocation5]   ;;  %v787_v32 = vpop.f32.mrf.mxu1 }
 0x45f   :  { %1000 = dma.done.wait [#allocation5], 128  }
 0x460   :  { %1001 = vsyncadd [#allocation5], 4294967168 }
 0x461   :  { %663 = vsyncpa [#allocation4], 1 }
 0x462   :  { %664 = vsyncpa [#allocation7], 1 }
 0x463   :  { %665 = vsyncpa [#allocation10], 1 }
 0x464   :  { %666 = vsyncpa [#allocation13], 1 }
 0x465   :  { %667 = vsyncpa [#allocation5], 1 }

</bundles_post_ra>
